<compile_context>
chip_gen: v7x
topology: tpu7x:2x2x1
jax: 0.10.0
libtpu: 0.0.40
codegen_flags: <defaults>
</compile_context>

<pallas_src>
import functools

import jax
import jax.numpy as jnp
from jax import lax
from jax.experimental import pallas as pl
from jax.experimental.pallas import tpu as pltpu


def _focal_loss_kernel(logits_ref, tgt_ref, alpha_ref, out_ref, *,
                       gamma, use_alpha, n_valid, tile_n):
    i = pl.program_id(0)

    logits = logits_ref[...].astype(jnp.float32)       # (C, TILE_N), f32 math
    tgt = tgt_ref[...]                                  # (1, TILE_N) int32
    c = logits.shape[0]

    # One-hot mask: class (sublane) iota vs. lane-dense targets. Computed once
    # and reused for both the target-logit gather and the alpha gather.
    cls = lax.broadcasted_iota(jnp.int32, (c, tile_n), 0)
    mask = (cls == tgt).astype(jnp.float32)             # (C, TILE_N)

    # log-softmax cross entropy over the class (sublane) axis.
    m = jnp.max(logits, axis=0, keepdims=True)          # (1, TILE_N)
    lse = m + jnp.log(jnp.sum(jnp.exp(logits - m), axis=0, keepdims=True))
    logit_t = jnp.sum(mask * logits, axis=0, keepdims=True)

    # Clamp so pt = exp(-ce) <= 1 (rounding can make lse - logit_t slightly
    # negative); avoids a negative base for the focal term.
    ce = jnp.maximum(lse - logit_t, 0.0)                # (1, TILE_N)
    pt = jnp.exp(-ce)
    one_minus_pt = 1.0 - pt

    # Integer gamma -> unrolled multiplies on the VPU (square for gamma=2);
    # non-integer gamma falls back to pow on a clamped base.
    if float(gamma) == int(gamma) and int(gamma) >= 0:
        mod = jnp.ones_like(one_minus_pt)
        for _ in range(int(gamma)):
            mod = mod * one_minus_pt
    else:
        mod = jnp.maximum(one_minus_pt, 0.0) ** jnp.float32(gamma)
    f_loss = mod * ce                                   # (1, TILE_N)

    if use_alpha:
        alpha = alpha_ref[...].astype(jnp.float32)      # (C, 1)
        alpha_t = jnp.sum(mask * alpha, axis=0, keepdims=True)
        f_loss = alpha_t * f_loss

    # Mask padded tail rows and emit this tile's partial sum.
    row = i * tile_n + lax.broadcasted_iota(jnp.int32, (1, tile_n), 1)
    valid = row < n_valid
    out_ref[0, 0] = jnp.sum(jnp.where(valid, f_loss, 0.0))


def focal_loss(logits, targets, alpha=None, gamma=2.0, tile_n=512):
    """logits: (N, C) float32/bf16; targets: (N,) int; alpha: (C,) or None."""
    n, c = logits.shape

    # Lane-dense layout: (C, N_pad) with N padded to a multiple of the tile.
    n_pad_min = max(128, ((n + 127) // 128) * 128)
    tile_n = min(int(tile_n), n_pad_min)
    n_pad = ((n + tile_n - 1) // tile_n) * tile_n
    num_tiles = n_pad // tile_n

    logits_t = jnp.zeros((c, n_pad), logits.dtype).at[:, :n].set(logits.T)
    tgt_row = jnp.zeros((1, n_pad), jnp.int32).at[0, :n].set(
        targets.astype(jnp.int32))

    use_alpha = alpha is not None
    if use_alpha:
        alpha_col = alpha.astype(jnp.float32).reshape(c, 1)
    else:
        alpha_col = jnp.ones((c, 1), jnp.float32)       # dummy, ignored

    kernel = functools.partial(
        _focal_loss_kernel, gamma=float(gamma), use_alpha=use_alpha,
        n_valid=n, tile_n=tile_n)

    partials = pl.pallas_call(
        kernel,
        out_shape=jax.ShapeDtypeStruct((num_tiles, 1), jnp.float32),
        grid=(num_tiles,),
        in_specs=[
            pl.BlockSpec((c, tile_n), lambda i: (0, i)),   # logits (C, TILE_N)
            pl.BlockSpec((1, tile_n), lambda i: (0, i)),   # targets (1, TILE_N)
            pl.BlockSpec((c, 1), lambda i: (0, 0)),        # alpha   (C, 1)
        ],
        out_specs=pl.BlockSpec(
            (1, 1), lambda i: (i, 0), memory_space=pltpu.MemorySpace.SMEM),
        compiler_params=pltpu.CompilerParams(
            dimension_semantics=("parallel",),
            vmem_limit_bytes=32 << 20,
        ),
    )(logits_t, tgt_row, alpha_col)

    # reduction='mean' over the true (unpadded) N.
    return jnp.sum(partials) / jnp.float32(n)


def focal_loss_ref(logits, targets, alpha=None, gamma=2.0):
    """Pure-JAX reference mirroring the PyTorch module."""
    lse = jax.scipy.special.logsumexp(logits, axis=-1)
    logit_t = jnp.take_along_axis(logits, targets[:, None], axis=-1)[:, 0]
    ce = lse - logit_t
    pt = jnp.exp(-ce)
    fl = (1.0 - pt) ** gamma * ce
    if alpha is not None:
        fl = alpha[targets] * fl
    return jnp.mean(fl)


if __name__ == "__main__":
    key = jax.random.PRNGKey(0)
    k1, k2 = jax.random.split(key)

    N, C = 64, 16  # batch of 64 samples, 16 classes
    logits = jax.random.normal(k1, (N, C), jnp.float32)
    targets = jax.random.randint(k2, (N,), 0, C, jnp.int32)
    # Deterministic per-class alpha weights (synthetic, in-script init).
    alpha = 0.25 + 0.5 * (jnp.arange(C, dtype=jnp.float32) / C)

    out = focal_loss(logits, targets, alpha=alpha, gamma=2.0)
    out = jax.block_until_ready(out)

    ref = focal_loss_ref(logits, targets, alpha=alpha, gamma=2.0)
    assert jnp.allclose(out, ref, rtol=1e-5, atol=1e-6), (out, ref)

    print("KERNEL_OK")
</pallas_src>

<mosaic_0001>
module attributes {stable_mosaic.version = 11 : i64} {
  func.func @_focal_loss_kernel(%arg0: i32, %arg1: memref<16x128xf32, #tpu.memory_space<vmem>>, %arg2: memref<1x128xi32, #tpu.memory_space<vmem>>, %arg3: memref<16x1xf32, #tpu.memory_space<vmem>>, %arg4: memref<1x1xf32, #tpu.memory_space<smem>>) attributes {dimension_semantics = [#tpu.dimension_semantics<parallel>], iteration_bounds = array<i64: 1>, scalar_prefetch = 0 : i64, scratch_operands = 0 : i64, tpu.core_type = #tpu.core_type<tc>, window_params = [{transform_indices = @transform_0, window_bounds = array<i64: 16, 128>}, {transform_indices = @transform_1, window_bounds = array<i64: 1, 128>}, {pipeline_mode = #tpu.pipeline_mode<synchronous>, transform_indices = @transform_2, window_bounds = array<i64: 16, 1>}, {transform_indices = @transform_3, window_bounds = array<i64: 1, 1>}]} {
    %c0 = arith.constant 0 : index
    %c0_0 = arith.constant 0 : index
    %0 = vector.load %arg1[%c0, %c0_0] : memref<16x128xf32, #tpu.memory_space<vmem>>, vector<16x128xf32>
    %c0_1 = arith.constant 0 : index
    %c0_2 = arith.constant 0 : index
    %1 = vector.load %arg2[%c0_1, %c0_2] : memref<1x128xi32, #tpu.memory_space<vmem>>, vector<1x128xi32>
    %2 = tpu.iota {dimensions = array<i32: 0>} : vector<16x128xi32>
    %3 = vector.broadcast %1 : vector<1x128xi32> to vector<16x128xi32>
    %4 = arith.cmpi eq, %2, %3 : vector<16x128xi32>
    %5 = arith.extui %4 : vector<16x128xi1> to vector<16x128xi32>
    %6 = arith.sitofp %5 : vector<16x128xi32> to vector<16x128xf32>
    %cst = arith.constant dense<0xFF800000> : vector<128xf32>
    %7 = vector.multi_reduction <maximumf>, %0, %cst [0] : vector<16x128xf32> to vector<128xf32>
    %8 = vector.shape_cast %7 : vector<128xf32> to vector<1x128xf32>
    %9 = vector.broadcast %8 : vector<1x128xf32> to vector<16x128xf32>
    %10 = arith.subf %0, %9 : vector<16x128xf32>
    %11 = math.exp %10 : vector<16x128xf32>
    %cst_3 = arith.constant dense<0.000000e+00> : vector<128xf32>
    %12 = vector.multi_reduction <add>, %11, %cst_3 [0] : vector<16x128xf32> to vector<128xf32>
    %13 = vector.shape_cast %12 : vector<128xf32> to vector<1x128xf32>
    %14 = math.log %13 : vector<1x128xf32>
    %15 = arith.addf %8, %14 : vector<1x128xf32>
    %16 = arith.mulf %6, %0 : vector<16x128xf32>
    %cst_4 = arith.constant dense<0.000000e+00> : vector<128xf32>
    %17 = vector.multi_reduction <add>, %16, %cst_4 [0] : vector<16x128xf32> to vector<128xf32>
    %18 = vector.shape_cast %17 : vector<128xf32> to vector<1x128xf32>
    %19 = arith.subf %15, %18 : vector<1x128xf32>
    %cst_5 = arith.constant 0.000000e+00 : f32
    %20 = vector.broadcast %cst_5 : f32 to vector<1x128xf32>
    %21 = arith.maximumf %19, %20 : vector<1x128xf32>
    %cst_6 = arith.constant 0.000000e+00 : f32
    %22 = vector.broadcast %cst_6 : f32 to vector<1x128xf32>
    %23 = arith.subf %22, %21 : vector<1x128xf32>
    %24 = math.exp %23 : vector<1x128xf32>
    %cst_7 = arith.constant 1.000000e+00 : f32
    %25 = vector.broadcast %cst_7 : f32 to vector<1x128xf32>
    %26 = arith.subf %25, %24 : vector<1x128xf32>
    %cst_8 = arith.constant 1.000000e+00 : f32
    %27 = vector.broadcast %cst_8 : f32 to vector<1x128xf32>
    %28 = arith.mulf %27, %26 : vector<1x128xf32>
    %29 = arith.mulf %28, %26 : vector<1x128xf32>
    %30 = arith.mulf %29, %21 : vector<1x128xf32>
    %c0_9 = arith.constant 0 : index
    %c0_10 = arith.constant 0 : index
    %31 = vector.load %arg3[%c0_9, %c0_10] : memref<16x1xf32, #tpu.memory_space<vmem>>, vector<16x1xf32>
    %32 = vector.broadcast %31 : vector<16x1xf32> to vector<16x128xf32>
    %33 = arith.mulf %6, %32 : vector<16x128xf32>
    %cst_11 = arith.constant dense<0.000000e+00> : vector<128xf32>
    %34 = vector.multi_reduction <add>, %33, %cst_11 [0] : vector<16x128xf32> to vector<128xf32>
    %35 = vector.shape_cast %34 : vector<128xf32> to vector<1x128xf32>
    %36 = arith.mulf %35, %30 : vector<1x128xf32>
    %c128_i32 = arith.constant 128 : i32
    %37 = arith.muli %arg0, %c128_i32 : i32
    %38 = tpu.iota {dimensions = array<i32: 1>} : vector<1x128xi32>
    %39 = vector.broadcast %37 : i32 to vector<1x128xi32>
    %40 = arith.addi %39, %38 : vector<1x128xi32>
    %c64_i32 = arith.constant 64 : i32
    %41 = vector.broadcast %c64_i32 : i32 to vector<1x128xi32>
    %42 = arith.cmpi slt, %40, %41 : vector<1x128xi32>
    %cst_12 = arith.constant 0.000000e+00 : f32
    %43 = vector.broadcast %cst_12 : f32 to vector<1x128xf32>
    %44 = arith.select %42, %36, %43 : vector<1x128xi1>, vector<1x128xf32>
    %45 = vector.shape_cast %44 : vector<1x128xf32> to vector<1x1x128xf32>
    %cst_13 = arith.constant dense<0.000000e+00> : vector<1xf32>
    %46 = vector.multi_reduction <add>, %45, %cst_13 [1, 2] : vector<1x1x128xf32> to vector<1xf32>
    %47 = vector.shape_cast %46 : vector<1xf32> to vector<1x1x1xf32>
    %48 = vector.extract %47[0, 0, 0] : f32 from vector<1x1x1xf32>
    %c0_14 = arith.constant 0 : index
    %c0_15 = arith.constant 0 : index
    %49 = memref.load %arg4[%c0_14, %c0_15] : memref<1x1xf32, #tpu.memory_space<smem>>
    memref.store %48, %arg4[%c0_14, %c0_15] : memref<1x1xf32, #tpu.memory_space<smem>>
    return
  }
  func.func @transform_0(%arg0: i32) -> (i32, i32) {
    %c0_i32 = arith.constant 0 : i32
    %c0_i32_0 = arith.constant 0 : i32
    return %c0_i32, %arg0 : i32, i32
  }
  func.func @transform_1(%arg0: i32) -> (i32, i32) {
    %c0_i32 = arith.constant 0 : i32
    %c0_i32_0 = arith.constant 0 : i32
    return %c0_i32, %arg0 : i32, i32
  }
  func.func @transform_2(%arg0: i32) -> (i32, i32) {
    %c0_i32 = arith.constant 0 : i32
    %c0_i32_0 = arith.constant 0 : i32
    %c0_i32_1 = arith.constant 0 : i32
    return %c0_i32, %c0_i32_0 : i32, i32
  }
  func.func @transform_3(%arg0: i32) -> (i32, i32) {
    %c0_i32 = arith.constant 0 : i32
    %c0_i32_0 = arith.constant 0 : i32
    return %arg0, %c0_i32 : i32, i32
  }
}

</mosaic_0001>

<bundles_post_ra>
// kernel: tpu_custom_call.1
= control target key start
LH: loop header
LB: loop body
LE: loop exit
PB: predicated region body
PF: predicated region fallthrough
CT: control target
= control target key end

     0   :  { %v155_v1 = vmov 0   ;;  %s205_s0 = inlined_call_operand.vmem [shape: f32[16,128], index: 0, kind: input, shape index: {}]   ;;  %s206_s1 = inlined_call_operand.vmem [shape: s32[1,128], index: 1, kind: input, shape index: {}]   ;;  %s207_s2 = inlined_call_operand.vmem [shape: f32[16,1], index: 2, kind: input, shape index: {}]   ;;  %s208_s3 = inlined_call_operand.hbm [shape: f32[1,1], index: 3, kind: output, shape index: {}]  }
   0x1   :  { %v71_v0 = vld [vmem:[%s207_s2] sm:$0xff]  ;;  %134 = vset.pattern.permute.xlu0 %v155_v1 }
   0x2   :  { %8 = vsyncpa [#allocation3], 0  ;;  %75 = vperm.xlu0 %134, %v71_v0   ;;  %v72_v2 = vld [vmem:[%s207_s2 + $0x8] sm:$0xff]  ;;  %v15_v3 = vld [vmem:[%s205_s0] sm:$0xff]  ;;  %v18_v18 = vlaneseq  ;;  %v156_v26 = vmov 0.0   ;;  %vm100_vm3 = vcmask 1040384  }
   0x3   :  { %v16_v4 = vld [vmem:[%s205_s0 + $0x8] sm:$0xff]  ;;  %v126_v23 = vld [vmem:[%s206_s1] ss:$0 sm:$0xff]  ;;  %s143_s22 = scalar_lea.hbm %s208_s3, 16 }
   0x4   :  { %v31_v5 = vmax.f32 %v15_v3, %v16_v4  ;;  %v19_v20 = vshrl.u32 %v18_v18, 7  ;;  %v95_v60 = vand.u32 127, %v18_v18  ;;  %p144_p0 = scmp.ne.s32.totalorder %s208_s3, %s143_s22  ;;  %p147_p1 = scmp.lt.u32.totalorder %s143_s22, %s208_s3 }
   0x6   :  { %80 = vperm.xlu0 %134, %v72_v2   ;;  %v32_v6 = vrot.slane %v31_v5, 4  ;;  %v20_v22 = vadd.s32 8, %v19_v20  ;;  %vm25_vm0 = vcmp.eq.s32.totalorder %v19_v20, %v126_v23  ;;  %vm98_vm2 = vcmp.lt.s32.totalorder %v95_v60, 64  ;;  %p149_p2 = pnand %p147_p1, %p144_p0 }
   0x7   :  { %v127_v27 = vsel %vm25_vm0, 1.0, %v156_v26 }
   0x8   :  { %v33_v7 = vmax.f32 %v31_v5, %v32_v6  ;;  %vm26_vm1 = vcmp.eq.s32.totalorder %v20_v22, %v126_v23  ;;  %v54_v30 = vmul.f32 %v127_v27, %v15_v3 }
   0x9   :  { %v128_v28 = vsel %vm26_vm1, 1.0, %v156_v26 }
   0xa   :  { %v34_v8 = vrot.slane %v33_v7, 2  ;;  %v55_v31 = vmul.f32 %v128_v28, %v16_v4 }
   0xc   :  { %v35_v9 = vmax.f32 %v33_v7, %v34_v8  ;;  %v56_v33 = vadd.f32 %v55_v31, %v54_v30 }
   0xe   :  { %v36_v10 = vrot.slane %v35_v9, 1  ;;  %v57_v35 = vrot.slane %v56_v33, 4 }
  0x10   :  { %v37_v11 = vmax.f32 %v35_v9, %v36_v10  ;;  %v58_v36 = vadd.f32 %v57_v35, %v56_v33 }
  0x12   :  { %v38_v12 = vsub.f32 %v15_v3, %v37_v11  ;;  %v39_v13 = vsub.f32 %v16_v4, %v37_v11  ;;  %v59_v37 = vrot.slane %v58_v36, 2 }
  0x14   :  { %v40_v14 = vmul.f32 1.442695, %v38_v12  ;;  %v42_v15 = vmul.f32 1.442695, %v39_v13  ;;  %v60_v38 = vadd.f32 %v59_v37, %v58_v36 }
  0x16   :  { %135 = vpow2.f32 %v40_v14  ;;  %v61_v40 = vrot.slane %v60_v38, 1 }
  0x17   :  { %137 = vpow2.f32 %v42_v15 }
  0x18   :  { %v62_v43 = vadd.f32 %v61_v40, %v60_v38 }
  0x20   :  { %v136_v16 = vpop.eup %135 }
  0x21   :  { %v138_v17 = vpop.eup %137 }
  0x22   :  { %v44_v19 = vadd.f32 %v138_v17, %v136_v16 }
  0x24   :  { %v45_v21 = vrot.slane %v44_v19, 4 }
  0x26   :  { %v46_v24 = vadd.f32 %v45_v21, %v44_v19 }
  0x28   :  { %v47_v25 = vrot.slane %v46_v24, 2 }
  0x2a   :  { %v48_v29 = vadd.f32 %v47_v25, %v46_v24 }
  0x2c   :  { %v49_v32 = vrot.slane %v48_v29, 1 }
  0x2e   :  { %v50_v34 = vadd.f32 %v49_v32, %v48_v29 }
  0x30   :  { %139 = vlog2.f32 %v50_v34 }
  0x3a   :  { %v140_v39 = vpop.eup %139 }
  0x3b   :  { %v52_v41 = vmul.f32 0.6931472, %v140_v39 }
  0x3d   :  { %v53_v42 = vadd.f32 %v52_v41, %v37_v11 }
  0x3f   :  { %v63_v44 = vsub.f32 %v53_v42, %v62_v43 }
  0x41   :  { %v64_v45 = vmax.f32 %v63_v44, 0.0 }
  0x43   :  { %v65_v46 = vsub.f32 0.0, %v64_v45 }
  0x45   :  { %v66_v47 = vmul.f32 1.442695, %v65_v46 }
  0x47   :  { %141 = vpow2.f32 %v66_v47 }
  0x51   :  { %v142_v52 = vpop.eup %141 }
  0x52   :  { %v68_v55 = vsub.f32 1.0, %v142_v52 }
  0x54   :  { %v69_v58 = vmul.f32 %v68_v55, %v68_v55 }
  0x56   :  { %v70_v61 = vmul.f32 %v69_v58, %v64_v45 }
  0x81   :  { %v76_v48 = vpop.permute.xlu0 %75 }
  0x82   :  { %v83_v50 = vmul.f32 %v127_v27, %v76_v48 }
  0x85   :  { %v81_v49 = vpop.permute.xlu0 %80 }
  0x86   :  { %v84_v51 = vmul.f32 %v128_v28, %v81_v49 }
  0x88   :  { %v85_v53 = vadd.f32 %v84_v51, %v83_v50 }
  0x8a   :  { %v86_v54 = vrot.slane %v85_v53, 4 }
  0x8c   :  { %v87_v56 = vadd.f32 %v86_v54, %v85_v53 }
  0x8e   :  { %v88_v57 = vrot.slane %v87_v56, 2 }
  0x90   :  { %v89_v59 = vadd.f32 %v88_v57, %v87_v56 }
  0x92   :  { %v90_v62 = vrot.slane %v89_v59, 1 }
  0x94   :  { %v91_v63 = vadd.f32 %v90_v62, %v89_v59 }
  0x96   :  { %v92_v0 = vmul.f32 %v91_v63, %v70_v61 }
  0x98   :  { %v99_v1 = vsel %vm98_vm2, %v92_v0, 0.0 }
  0x99   :  { %v101_v2 = vsel %vm100_vm3, %v99_v1, 0.0 }
  0x9a   :  { %102 = vadd.xlane.f32.xlu1 %v101_v2 }
 0x127   :  { %v103_v3 = vpop.xlane.xlu1 %102 }
 0x128   :  { %v104_v4 = vrot.slane %v103_v3, 4 }
 0x12a   :  { %v105_v5 = vadd.f32 %v104_v4, %v103_v3 }
 0x12c   :  { %v106_v6 = vrot.slane %v105_v5, 2 }
 0x12e   :  { %v107_v7 = vadd.f32 %v106_v6, %v105_v5 }
 0x130   :  { %v108_v8 = vrot.slane %v107_v7, 1 }
 0x132   :  { %v109_v9 = vadd.f32 %v108_v8, %v107_v7 }
 0x134   :  { %129 = vpush %v109_v9 }
 0x165   :  { %s130_s1 = spop %129 }
 0x166   :  { %112 = sst [smem:[#allocation2]] %s130_s1 }
 0x167   :  { %152 = shalt.err (!%p149_p2)
}
 0x168   :  { %s157_s27 = smov [#allocation2]  }
 0x169   :  { %120 = dma.smem_to_hbm %s157_s27, 16, %s208_s3, [#allocation3]  }
 0x16a   :  { %153 = dma.done.wait [#allocation3], 16  }
 0x16b   :  { %154 = vsyncadd [#allocation3], 4294967280 }
 0x16c   :  { %124 = sfence }
 0x16d   :  { %125 = vsyncpa [#allocation3], 1 }

</bundles_post_ra>
